<compile_context>
chip_gen: v7x
topology: tpu7x:2x2x1
jax: 0.10.0
libtpu: 0.0.40
codegen_flags: <defaults>
</compile_context>

<pallas_src>
import jax
import jax.numpy as jnp
import numpy as np
from jax.experimental import pallas as pl
from jax.experimental.pallas import tpu as pltpu


# ----------------------------------------------------------------------------
# Deterministic parameter construction (shapes from Network.__init__).
# Unused by forward() (which is identity); built once, off the hot path, only
# to honor the module definition.
# ----------------------------------------------------------------------------
def init_params(key):
    ks = jax.random.split(key, 10)
    return {
        "conv1_w": jax.random.normal(ks[0], (6, 1, 5, 5), jnp.float32) * 0.1,
        "conv1_b": jax.random.normal(ks[1], (6,), jnp.float32) * 0.1,
        "conv2_w": jax.random.normal(ks[2], (12, 6, 5, 5), jnp.float32) * 0.1,
        "conv2_b": jax.random.normal(ks[3], (12,), jnp.float32) * 0.1,
        "fc1_w": jax.random.normal(ks[4], (120, 12 * 4 * 4), jnp.float32) * 0.1,
        "fc1_b": jax.random.normal(ks[5], (120,), jnp.float32) * 0.1,
        "fc2_w": jax.random.normal(ks[6], (60, 120), jnp.float32) * 0.1,
        "fc2_b": jax.random.normal(ks[7], (60,), jnp.float32) * 0.1,
        "out_w": jax.random.normal(ks[8], (10, 60), jnp.float32) * 0.1,
        "out_b": jax.random.normal(ks[9], (10,), jnp.float32) * 0.1,
    }


# ----------------------------------------------------------------------------
# Pallas kernel: identity — the entire forward pass of Network.
# ----------------------------------------------------------------------------
def identity_kernel(x_ref, o_ref):
    o_ref[...] = x_ref[...]


def _lane_dense_view(t):
    """Pick a 2-D contiguous view with full sublane occupancy when possible."""
    total = t.size
    if total % 8 == 0:
        rows = 8                      # full (8, ...) sublane occupancy
    else:
        rows = t.shape[0]
    return t.reshape(rows, total // rows)


def _network_forward_impl(t):
    """Forward pass of Network: `return t` (identity)."""
    # (2,1,28,28) -> (8,196): contiguous metadata-only reshape.  8 sublanes
    # fully used; 196 lanes = one full 128-lane group + one masked tail — the
    # densest layout reachable without adding pad/slice copies (1568 has no
    # factorization with a 128-multiple last dim).
    flat = _lane_dense_view(t)
    out = pl.pallas_call(
        identity_kernel,
        out_shape=jax.ShapeDtypeStruct(flat.shape, flat.dtype),
        # Grid-less, whole-array VMEM specs: one DMA in, one vreg copy, one
        # DMA out.  No grid / dimension_semantics / scratch — at this size any
        # tiling is pure per-step overhead (~0.35 us each).
        in_specs=[pl.BlockSpec(memory_space=pltpu.MemorySpace.VMEM)],
        out_specs=pl.BlockSpec(memory_space=pltpu.MemorySpace.VMEM),
        # Output aliases input: drops the second HBM buffer / writeback.
        input_output_aliases={0: 0},
    )(flat)
    return out.reshape(t.shape)


# NOTE: the input buffer is donated AND aliased to the output.  Callers must
# not reuse the argument array after calling network_forward (it is consumed).
network_forward = jax.jit(_network_forward_impl, donate_argnums=(0,))


if __name__ == "__main__":
    key = jax.random.PRNGKey(0)
    pkey, xkey = jax.random.split(key)

    # Parameters exist only to mirror the module; forward never reads them.
    params = init_params(pkey)

    # Input consistent with the module (conv1 expects 1 input channel; fc1's
    # 12*4*4 implies a 28x28 MNIST-style input), NCHW layout, batch=2.
    x = jax.random.normal(xkey, (2, 1, 28, 28), jnp.float32)

    # Snapshot the expected result on host BEFORE the donated/aliased call.
    x_expected = np.asarray(jax.device_get(x))

    y = network_forward(x)
    y = jax.block_until_ready(y)

    # Verify identity semantics.
    y_np = np.asarray(jax.device_get(y))
    assert y_np.shape == x_expected.shape and y_np.dtype == x_expected.dtype
    assert np.array_equal(y_np, x_expected)

    print("KERNEL_OK")
</pallas_src>

<mosaic_0001>
module attributes {stable_mosaic.version = 11 : i64} {
  func.func @identity_kernel(%arg0: memref<8x196xf32, #tpu.memory_space<vmem>>, %arg1: memref<8x196xf32, #tpu.memory_space<vmem>>) attributes {dimension_semantics = [], scalar_prefetch = 0 : i64, scratch_operands = 0 : i64, tpu.core_type = #tpu.core_type<tc>} {
    %c0 = arith.constant 0 : index
    %c0_0 = arith.constant 0 : index
    %0 = vector.load %arg0[%c0, %c0_0] : memref<8x196xf32, #tpu.memory_space<vmem>>, vector<8x196xf32>
    %c0_1 = arith.constant 0 : index
    %c0_2 = arith.constant 0 : index
    %1 = vector.load %arg1[%c0_1, %c0_2] : memref<8x196xf32, #tpu.memory_space<vmem>>, vector<8x196xf32>
    tpu.vector_store %arg1[%c0_1, %c0_2], %0 {strides = array<i32>} : memref<8x196xf32, #tpu.memory_space<vmem>>, vector<8x196xf32>,
    return
  }
}

</mosaic_0001>

<bundles_post_ra>
// kernel: _network_forward_impl.1
= control target key start
LH: loop header
LB: loop body
LE: loop exit
PB: predicated region body
PF: predicated region fallthrough
CT: control target
= control target key end

     0   :  { %vm11_vm0 = vcmask 556032   ;;  %s39_s0 = inlined_call_operand.vmem [shape: f32[8,196], index: 0, kind: input, shape index: {}, may-alias: {0,1}]   ;;  %s40_s1 = inlined_call_operand.vmem [shape: f32[8,196], index: 1, kind: output, shape index: {}, may-alias: {0,1}]  }
   0x1   :  { %v8_v0 = vld [vmem:[%s39_s0] sm:$0xff]  ;;  %v9_v1 = vld [vmem:[%s39_s0 + $0x8] sm:$0xff] }
   0x2   :  { %10 = vst [vmem:[%s40_s1] sm:$0xff] %v8_v0  ;;  %12 = vst.msk [vmem:[%s40_s1 + $0x8] sm:$0xff] %vm11_vm0, %v9_v1 }

</bundles_post_ra>
